<compile_context>
chip_gen: v7x
topology: tpu7x:2x2x1
jax: 0.10.0
libtpu: 0.0.40
codegen_flags: <defaults>
</compile_context>

<pallas_src>
import jax
import jax.numpy as jnp
from jax.experimental import pallas as pl
from jax.experimental.pallas import tpu as pltpu

_LANES = 128
_TARGET_BLOCK_BYTES = 4 * 1024 * 1024   # ~4 MiB input blocks (safe on v7x)
_SINGLE_BLOCK_BYTES = 2 * 1024 * 1024   # below this: grid = 1
_MIN_GRID_STEPS = 4                     # and always an even step count
_VMEM_LIMIT_BYTES = 32 * 1024 * 1024    # do NOT raise on v7x (64 MiB/TC physical)


def _act_kernel(x_ref, o_ref):
    # 2*sigmoid(x) == 1 + tanh(x/2): one EUP transcendental, one mul, one add.
    xf = x_ref[...].astype(jnp.float32)
    o_ref[...] = (1.0 + jnp.tanh(0.5 * xf)).astype(o_ref.dtype)


def act_op(x):
    """Elementwise 2*sigmoid(x) (Act_op.forward) as a Pallas TPU kernel."""
    if not jnp.issubdtype(x.dtype, jnp.floating):
        # PyTorch F.sigmoid also rejects integer inputs.
        raise TypeError(f"act_op expects a floating dtype, got {x.dtype}")

    orig_shape = x.shape
    dtype = x.dtype
    n = x.size
    if n == 0:
        return x

    itemsize = jnp.dtype(dtype).itemsize
    # Sublane packing of the second-minor dim: 8 (32-bit), 16 (bf16), 32 (8-bit).
    sublane = max(8, 32 // itemsize)

    if n % _LANES == 0:
        # Fast path: pure reshape to a lane-dense (rows, 128) slab -- no copy.
        # rows need NOT be a multiple of `sublane`: Pallas clips the partial
        # final block, and a grid=1 block equals the full array dims.
        rows = n // _LANES
        x2d = x.reshape(rows, _LANES)
        padded = False
    else:
        # Ragged tail: pad the flat vector only to the next multiple of 128.
        # TODO(synk): this still costs one extra HBM pass for the pad and one
        # for the final slice; a fully copy-free ragged path needs 1-D blocks
        # or an in-kernel masked store of the last block.
        rows = pl.cdiv(n, _LANES)
        x2d = jnp.pad(x.reshape(-1), (0, rows * _LANES - n)).reshape(rows, _LANES)
        padded = True

    slab_bytes = rows * _LANES * itemsize
    if slab_bytes <= _SINGLE_BLOCK_BYTES:
        # One full-extent block (allowed even when rows % sublane != 0).
        tile_rows = rows
        grid_steps = 1
    else:
        # At least 4 and an even number of steps; blocks near ~4 MiB.
        steps = max(_MIN_GRID_STEPS, pl.cdiv(slab_bytes, _TARGET_BLOCK_BYTES))
        steps = steps + (steps % 2)
        tile_rows = pl.cdiv(rows, steps)
        tile_rows = ((tile_rows + sublane - 1) // sublane) * sublane
        grid_steps = pl.cdiv(rows, tile_rows)

    out2d = pl.pallas_call(
        _act_kernel,
        out_shape=jax.ShapeDtypeStruct((rows, _LANES), dtype),
        grid=(grid_steps,),
        in_specs=[pl.BlockSpec((tile_rows, _LANES), lambda i: (i, 0))],
        out_specs=pl.BlockSpec((tile_rows, _LANES), lambda i: (i, 0)),
        compiler_params=pltpu.CompilerParams(
            dimension_semantics=("parallel",),
            vmem_limit_bytes=_VMEM_LIMIT_BYTES,
        ),
        cost_estimate=pl.CostEstimate(
            flops=2 * n,
            transcendentals=n,
            bytes_accessed=2 * n * itemsize,
        ),
    )(x2d)

    if padded:
        return out2d.reshape(-1)[:n].reshape(orig_shape)
    return out2d.reshape(orig_shape)


def _ref(x):
    return (2.0 * jax.nn.sigmoid(x.astype(jnp.float32))).astype(x.dtype)


if __name__ == "__main__":
    key = jax.random.PRNGKey(0)

    # 1) Small NCHW input consistent with the conv-style model: grid=1 fast path.
    x = jax.random.normal(key, (2, 4, 16, 16), dtype=jnp.float32)
    y = jax.block_until_ready(act_op(x))
    assert y.shape == x.shape and y.dtype == x.dtype
    assert jnp.allclose(y, _ref(x), atol=1e-5, rtol=1e-5)

    # 2) Ragged size exercising the minimal-pad path (pad to next 128 only).
    x2 = jax.random.normal(jax.random.PRNGKey(1), (3, 5, 7), dtype=jnp.float32)
    y2 = jax.block_until_ready(act_op(x2))
    assert y2.shape == x2.shape and y2.dtype == x2.dtype
    assert jnp.allclose(y2, _ref(x2), atol=1e-5, rtol=1e-5)

    # 3) Aligned >2 MiB slab: no-copy fast path, >=4 even grid steps with a
    #    partial (Pallas-clipped) final block.
    x3 = jax.random.normal(jax.random.PRNGKey(2), (4, 1250, 128), dtype=jnp.float32)
    y3 = jax.block_until_ready(act_op(x3))
    assert y3.shape == x3.shape and y3.dtype == x3.dtype
    assert jnp.allclose(y3, _ref(x3), atol=1e-5, rtol=1e-5)

    # 4) bf16 input (sublane=16 path; f32 compute, bf16 store).
    x4 = jax.random.normal(jax.random.PRNGKey(3), (2, 4, 16, 16), dtype=jnp.bfloat16)
    y4 = jax.block_until_ready(act_op(x4))
    assert y4.shape == x4.shape and y4.dtype == x4.dtype
    assert jnp.allclose(y4.astype(jnp.float32), _ref(x4).astype(jnp.float32),
                        atol=2e-2, rtol=2e-2)

    print("KERNEL_OK")
</pallas_src>

<mosaic_0001>
module attributes {stable_mosaic.version = 11 : i64} {
  func.func @_act_kernel(%arg0: i32, %arg1: memref<16x128xf32, #tpu.memory_space<vmem>>, %arg2: memref<16x128xf32, #tpu.memory_space<vmem>>) attributes {dimension_semantics = [#tpu.dimension_semantics<parallel>], iteration_bounds = array<i64: 1>, scalar_prefetch = 0 : i64, scratch_operands = 0 : i64, tpu.core_type = #tpu.core_type<tc>, window_params = [{transform_indices = @transform_0, window_bounds = array<i64: 16, 128>}, {transform_indices = @transform_1, window_bounds = array<i64: 16, 128>}]} {
    %c0 = arith.constant 0 : index
    %c0_0 = arith.constant 0 : index
    %0 = vector.load %arg1[%c0, %c0_0] : memref<16x128xf32, #tpu.memory_space<vmem>>, vector<16x128xf32>
    %cst = arith.constant 5.000000e-01 : f32
    %1 = vector.broadcast %cst : f32 to vector<16x128xf32>
    %2 = arith.mulf %1, %0 : vector<16x128xf32>
    %3 = math.tanh %2 : vector<16x128xf32>
    %cst_1 = arith.constant 1.000000e+00 : f32
    %4 = vector.broadcast %cst_1 : f32 to vector<16x128xf32>
    %5 = arith.addf %4, %3 : vector<16x128xf32>
    %c0_2 = arith.constant 0 : index
    %c0_3 = arith.constant 0 : index
    %6 = vector.load %arg2[%c0_2, %c0_3] : memref<16x128xf32, #tpu.memory_space<vmem>>, vector<16x128xf32>
    tpu.vector_store %arg2[%c0_2, %c0_3], %5 {strides = array<i32>} : memref<16x128xf32, #tpu.memory_space<vmem>>, vector<16x128xf32>,
    return
  }
  func.func @transform_0(%arg0: i32) -> (i32, i32) {
    %c0_i32 = arith.constant 0 : i32
    %c0_i32_0 = arith.constant 0 : i32
    return %arg0, %c0_i32 : i32, i32
  }
  func.func @transform_1(%arg0: i32) -> (i32, i32) {
    %c0_i32 = arith.constant 0 : i32
    %c0_i32_0 = arith.constant 0 : i32
    return %arg0, %c0_i32 : i32, i32
  }
}

</mosaic_0001>

<bundles_post_ra>
// kernel: tpu_custom_call.1
= control target key start
LH: loop header
LB: loop body
LE: loop exit
PB: predicated region body
PF: predicated region fallthrough
CT: control target
= control target key end

     0   :  { %6 = vsyncpa [#allocation3], 0  ;;  %s150_s0 = inlined_call_operand.hbm [shape: f32[16,128], index: 0, kind: input, shape index: {}]   ;;  %s151_s1 = inlined_call_operand.hbm [shape: f32[16,128], index: 1, kind: output, shape index: {}]  }
   0x1   :  { %7 = vsyncpa [#allocation4], 0  ;;  %s106_s6 = smov [#allocation2]   ;;  %s58_s10 = scalar_lea.hbm %s150_s0, 256 }
   0x2   :  { %s13_s7 = sshll.u32 %s106_s6, 4  ;;  %p59_p0 = scmp.ne.s32.totalorder %s150_s0, %s58_s10  ;;  %s14_s7 = int_to_ptr.vmem [resolvable:$true] %s13_s7 }
   0x3   :  { %p62_p1 = scmp.lt.u32.totalorder %s58_s10, %s150_s0 }
   0x5   :  { %p64_p2 = pnand %p62_p1, %p59_p0 }
   0x7   :  { %67 = shalt.err (!%p64_p2)
}
   0x8   :  { %s68_s15 = scalar_lea.vmem %s14_s7, 256  ;;  %p73_p4 = scmp.lt.s32.totalorder %s14_s7, %s14_s7 }
   0x9   :  { %p69_p3 = scmp.ne.s32.totalorder %s14_s7, %s68_s15  ;;  %p74_p5 = scmp.lt.s32.totalorder %s68_s15, %s68_s15 }
   0xb   :  { %p75_p6 = por %p74_p5, %p73_p4 }
   0xd   :  { %p76_p7 = pnand %p75_p6, %p69_p3 }
   0xf   :  { %79 = shalt.err (!%p76_p7)
}
  0x10   :  { %s107_s16 = smov 128   ;;  %s108_s17 = smov 8  }
  0x11   :  { %19 = dma.hbm_to_vmem [thread:$0]  %s150_s0, 256, %s14_s7, [#allocation3], %s107_s16, %s107_s16, %s108_s17  }
  0x12   :  { %102 = dma.done.wait [#allocation3], 256  }
  0x13   :  { %103 = vsyncadd [#allocation3], 4294967040  ;;  %v23_v0 = vld [vmem:[#allocation2] sm:$0xff]  ;;  %v24_v1 = vld [vmem:[#allocation2 + $0x8] sm:$0xff]  ;;  %s109_s20 = smov [#allocation5]  }
  0x14   :  { %v25_v2 = vmul.f32 0.5, %v23_v0  ;;  %v26_v3 = vmul.f32 0.5, %v24_v1  ;;  %s38_s21 = sshll.u32 %s109_s20, 4  ;;  %s39_s21 = int_to_ptr.vmem [resolvable:$true] %s38_s21 }
  0x15   :  { %s80_s22 = scalar_lea.vmem %s39_s21, 256  ;;  %p85_p9 = scmp.lt.s32.totalorder %s39_s21, %s39_s21 }
  0x16   :  { %54 = vtanh.f32 %v25_v2  ;;  %p81_p8 = scmp.ne.s32.totalorder %s39_s21, %s80_s22  ;;  %p86_p10 = scmp.lt.s32.totalorder %s80_s22, %s80_s22 }
  0x17   :  { %56 = vtanh.f32 %v26_v3 }
  0x18   :  { %p87_p11 = por %p86_p10, %p85_p9 }
  0x1a   :  { %p88_p12 = pnand %p87_p11, %p81_p8 }
  0x20   :  { %v55_v4 = vpop.eup %54 }
  0x21   :  { %v57_v5 = vpop.eup %56  ;;  %v29_v6 = vadd.f32 1.0, %v55_v4 }
  0x22   :  { %v30_v7 = vadd.f32 1.0, %v57_v5 }
  0x23   :  { %31 = vst [vmem:[#allocation5] sm:$0xff] %v29_v6 }
  0x24   :  { %32 = vst [vmem:[#allocation5 + $0x8] sm:$0xff] %v30_v7 }
  0x25   :  { %91 = shalt.err (!%p88_p12)
}
  0x26   :  { %s92_s24 = scalar_lea.hbm %s151_s1, 256 }
  0x27   :  { %p93_p13 = scmp.ne.s32.totalorder %s151_s1, %s92_s24  ;;  %p96_p0 = scmp.lt.u32.totalorder %s92_s24, %s151_s1 }
  0x29   :  { %p98_p1 = pnand %p96_p0, %p93_p13 }
  0x2b   :  { %101 = shalt.err (!%p98_p1)
}
  0x2c   :  { %44 = dma.vmem_to_hbm [thread:$0]  %s39_s21, 256, %s151_s1, [#allocation4], %s107_s16, %s107_s16, %s108_s17  }
  0x2d   :  { %104 = dma.done.wait [#allocation4], 256  }
  0x2e   :  { %105 = vsyncadd [#allocation4], 4294967040 }
  0x2f   :  { %48 = vsyncpa [#allocation3], 1 }
  0x30   :  { %49 = vsyncpa [#allocation4], 1 }

</bundles_post_ra>
